<compile_context>
chip_gen: v5e
topology: v5e:2x2
jax: 0.10.0
libtpu: 0.0.40
codegen_flags: <defaults>
</compile_context>

<pallas_src>
import functools

import jax
import jax.numpy as jnp
from jax.experimental import pallas as pl
from jax.experimental.pallas import tpu as pltpu


_LANE = 128            # lane width (last-dim tiling quantum)
_SUBLANE_BF16 = 16     # bf16 packs 16 rows per vreg along sublanes
_VMEM_TILE_BUDGET = 40 << 20   # cap on double-buffered tile footprint (fits v7x)
_VMEM_LIMIT_BYTES = 48 << 20   # scoped-VMEM limit handed to Mosaic
_FAST_X_BYTES = 8 << 20        # "whole x resident" fast-path threshold


def _round_up(x, m):
    return ((x + m - 1) // m) * m


# --------------------------------------------------------------- kernels ----

def _fc_kernel_nok(x_ref, wt_ref, b_ref, o_ref, *, relu):
    """2-D grid (no K axis): whole contraction dim in one block."""
    out = jnp.dot(x_ref[...], wt_ref[...], preferred_element_type=jnp.float32)
    out = out + b_ref[...].astype(jnp.float32)
    if relu:
        out = jnp.maximum(out, 0.0)
    o_ref[...] = out.astype(o_ref.dtype)


def _fc_kernel_f32out(x_ref, wt_ref, b_ref, o_ref, *, relu):
    """3-D grid, f32 output: accumulate directly into the resident out tile."""
    k = pl.program_id(2)
    part = jnp.dot(x_ref[...], wt_ref[...], preferred_element_type=jnp.float32)

    @pl.when(k == 0)
    def _first():
        o_ref[...] = part            # no zero-init + '+=' on the first step

    @pl.when(k > 0)
    def _accum():
        o_ref[...] += part

    @pl.when(k == pl.num_programs(2) - 1)
    def _finalize():
        out = o_ref[...] + b_ref[...].astype(jnp.float32)
        if relu:
            out = jnp.maximum(out, 0.0)
        o_ref[...] = out


def _fc_kernel_acc(x_ref, wt_ref, b_ref, o_ref, acc_ref, *, relu):
    """3-D grid, narrow output dtype: f32 VMEM scratch accumulator."""
    k = pl.program_id(2)
    part = jnp.dot(x_ref[...], wt_ref[...], preferred_element_type=jnp.float32)

    @pl.when(k == 0)
    def _first():
        acc_ref[...] = part

    @pl.when(k > 0)
    def _accum():
        acc_ref[...] += part

    @pl.when(k == pl.num_programs(2) - 1)
    def _finalize():
        out = acc_ref[...] + b_ref[...].astype(jnp.float32)
        if relu:
            out = jnp.maximum(out, 0.0)
        o_ref[...] = out.astype(o_ref.dtype)


# ------------------------------------------------------------- parameters ---

def prepare_fc_params(weight, bias, compute_dtype=jnp.bfloat16):
    """One-time setup: transpose + cast weight, reshape bias (do once, outside jit)."""
    OUT, IN = weight.shape
    wt = jnp.asarray(weight).T.astype(compute_dtype)          # [IN, OUT]
    b2 = jnp.asarray(bias, dtype=jnp.float32).reshape(1, OUT)
    return wt, b2


# ---------------------------------------------------------- tile selection --

def _tile_footprint(bb, bn, bk, x_bytes, w_bytes, out_bytes, use_acc):
    fp = 2 * (bb * bk * x_bytes + bk * bn * w_bytes + bb * bn * out_bytes)
    fp += 2 * bn * 4                    # bias tile (double-buffered, tiny)
    if use_acc:
        fp += bb * bn * 4               # f32 scratch accumulator
    return fp


def _select_tiles(B, IN, OUT, x_bytes, w_bytes, out_bytes, use_acc,
                  block_b, block_n, block_k, allow_fast_path):
    # batch tile: 16-aligned (bf16 sublane packing), or full padded B
    bb = _round_up(B, _SUBLANE_BF16) if B <= block_b else block_b
    # output tile: lane-dense; full padded OUT when it fits one tile
    bn = _round_up(OUT, _LANE) if OUT <= block_n else block_n
    # contraction tile
    bk = _round_up(IN, _LANE) if IN <= block_k else block_k

    # Small-x fast path: whole x resident in VMEM -> no K axis, no re-fetch of x.
    if allow_fast_path:
        b_pad = _round_up(B, _SUBLANE_BF16)
        in_pad = _round_up(IN, _LANE)
        if b_pad * in_pad * x_bytes <= _FAST_X_BYTES and b_pad <= 1024:
            bb = b_pad
            bk = in_pad

    # v7x megacore: keep the parallel tile count even when it is cheap to do so.
    nb_tiles = _round_up(B, bb) // bb
    nn_tiles = _round_up(OUT, bn) // bn
    if ((nb_tiles * nn_tiles) % 2 == 1 and nb_tiles * nn_tiles > 1
            and bn >= 512 and bn % 256 == 0):
        bn //= 2

    # VMEM budget: shrink K first (never the output-N unless forced).
    while _tile_footprint(bb, bn, bk, x_bytes, w_bytes, out_bytes,
                          use_acc) > _VMEM_TILE_BUDGET:
        if bk > 256 and bk % 256 == 0:
            bk //= 2
        elif bb > 128 and bb % 32 == 0:
            bb //= 2
        elif bn > 256 and bn % 256 == 0:
            bn //= 2
        else:
            break
    return bb, bn, bk


# ---------------------------------------------------------------- forward ---

def fc_forward(x, wt, b2, relu=True, *,
               block_b=512, block_n=512, block_k=2048,
               w_buffers=2, allow_fast_path=True):
    """Pallas FC forward.

    x:  [B, IN]   (any float dtype; cast once to wt.dtype here)
    wt: [IN, OUT] (pre-transposed weight from prepare_fc_params)
    b2: [1, OUT]  f32 bias
    returns [B, OUT] in x.dtype
    """
    B, IN = x.shape
    IN_w, OUT = wt.shape
    assert IN == IN_w, (IN, IN_w)
    assert b2.shape == (1, OUT), b2.shape

    out_dtype = x.dtype
    compute_dtype = wt.dtype
    # Cast activations ONCE here (not per k-tile inside the kernel).
    if x.dtype != compute_dtype:
        x = x.astype(compute_dtype)

    x_bytes = jnp.dtype(compute_dtype).itemsize
    w_bytes = jnp.dtype(compute_dtype).itemsize
    out_bytes = jnp.dtype(out_dtype).itemsize
    f32_out = jnp.dtype(out_dtype) == jnp.float32

    bb, bn, bk = _select_tiles(B, IN, OUT, x_bytes, w_bytes, out_bytes,
                               not f32_out, block_b, block_n, block_k,
                               allow_fast_path)

    # Pad up to tile multiples (zero pad is exact for matmul+bias+ReLU); a
    # no-op when shapes already divide. Result is sliced back at the end.
    B_pad = _round_up(B, bb)
    OUT_pad = _round_up(OUT, bn)
    IN_pad = _round_up(IN, bk)
    if (B_pad, IN_pad) != (B, IN):
        x = jnp.pad(x, ((0, B_pad - B), (0, IN_pad - IN)))
    if (IN_pad, OUT_pad) != (IN, OUT):
        wt = jnp.pad(wt, ((0, IN_pad - IN), (0, OUT_pad - OUT)))
    if OUT_pad != OUT:
        b2 = jnp.pad(b2, ((0, 0), (0, OUT_pad - OUT)))

    nk = IN_pad // bk
    n_b = B_pad // bb
    n_n = OUT_pad // bn

    cost = pl.CostEstimate(
        flops=2 * B_pad * IN_pad * OUT_pad,
        bytes_accessed=(B_pad * IN_pad * x_bytes * n_n        # x re-read per OUT tile
                        + IN_pad * OUT_pad * w_bytes * n_b    # W re-read per B tile
                        + B_pad * OUT_pad * out_bytes),
        transcendentals=0)

    w_pipeline = {} if w_buffers == 2 else dict(pipeline_mode=pl.Buffered(w_buffers))

    if nk == 1:
        grid = (n_b, n_n)
        in_specs = [
            pl.BlockSpec((bb, bk), lambda i, j: (i, 0)),
            pl.BlockSpec((bk, bn), lambda i, j: (0, j), **w_pipeline),
            pl.BlockSpec((1, bn), lambda i, j: (0, j)),
        ]
        out_specs = pl.BlockSpec((bb, bn), lambda i, j: (i, j))
        kernel = functools.partial(_fc_kernel_nok, relu=relu)
        scratch_shapes = []
        dims = ("parallel", "parallel")
    else:
        grid = (n_b, n_n, nk)           # reduction axis last
        in_specs = [
            pl.BlockSpec((bb, bk), lambda i, j, k: (i, k)),
            pl.BlockSpec((bk, bn), lambda i, j, k: (k, j), **w_pipeline),
            pl.BlockSpec((1, bn), lambda i, j, k: (0, j)),
        ]
        out_specs = pl.BlockSpec((bb, bn), lambda i, j, k: (i, j))
        if f32_out:
            kernel = functools.partial(_fc_kernel_f32out, relu=relu)
            scratch_shapes = []
        else:
            kernel = functools.partial(_fc_kernel_acc, relu=relu)
            scratch_shapes = [pltpu.VMEM((bb, bn), jnp.float32)]
        dims = ("parallel", "parallel", "arbitrary")

    y = pl.pallas_call(
        kernel,
        out_shape=jax.ShapeDtypeStruct((B_pad, OUT_pad), out_dtype),
        grid_spec=pltpu.PrefetchScalarGridSpec(
            num_scalar_prefetch=0,
            grid=grid,
            in_specs=in_specs,
            out_specs=out_specs,
            scratch_shapes=scratch_shapes),
        compiler_params=pltpu.CompilerParams(
            dimension_semantics=dims,
            vmem_limit_bytes=_VMEM_LIMIT_BYTES),
        cost_estimate=cost,
    )(x, wt, b2)

    if (B_pad, OUT_pad) != (B, OUT):
        y = y[:B, :OUT]
    return y


# -------------------------------------------------------------- reference ---

def _ref_fc(x, weight, bias, relu, compute_dtype):
    """Pure-JAX reference emulating bf16 MXU inputs with f32 accumulation."""
    xr = x.astype(compute_dtype).astype(jnp.float32)
    wr = weight.astype(compute_dtype).astype(jnp.float32)
    y = xr @ wr.T + bias.astype(jnp.float32)
    if relu:
        y = jnp.maximum(y, 0.0)
    return y


if __name__ == "__main__":
    key = jax.random.PRNGKey(0)
    keys = jax.random.split(key, 9)

    # --- Test 1: small, padded, fast (no-K) path -----------------------------
    B, IN, OUT = 8, 32, 64
    x = jax.random.normal(keys[0], (B, IN), dtype=jnp.float32)
    bound = 1.0 / (IN ** 0.5)
    weight = jax.random.uniform(keys[1], (OUT, IN), jnp.float32, -bound, bound)
    bias = jax.random.uniform(keys[2], (OUT,), jnp.float32, -bound, bound)

    wt, b2 = prepare_fc_params(weight, bias)
    y = jax.block_until_ready(fc_forward(x, wt, b2, relu=True))
    y_ref = _ref_fc(x, weight, bias, relu=True, compute_dtype=jnp.bfloat16)
    assert y.shape == (B, OUT)
    assert jnp.allclose(y, y_ref, atol=2e-3, rtol=2e-3), "test1 mismatch"

    # --- Test 2: 3-D grid, f32 output accumulated directly into o_ref --------
    B2, IN2, OUT2 = 128, 1024, 384
    x2 = jax.random.normal(keys[3], (B2, IN2), dtype=jnp.float32)
    bound2 = 1.0 / (IN2 ** 0.5)
    weight2 = jax.random.uniform(keys[4], (OUT2, IN2), jnp.float32, -bound2, bound2)
    bias2 = jax.random.uniform(keys[5], (OUT2,), jnp.float32, -bound2, bound2)

    wt2, b22 = prepare_fc_params(weight2, bias2)
    y2 = jax.block_until_ready(
        fc_forward(x2, wt2, b22, relu=True, block_k=256, allow_fast_path=False))
    y2_ref = _ref_fc(x2, weight2, bias2, relu=True, compute_dtype=jnp.bfloat16)
    assert y2.shape == (B2, OUT2)
    assert jnp.allclose(y2, y2_ref, atol=2e-3, rtol=2e-3), "test2 mismatch"

    # --- Test 3: 3-D grid, bf16 output via f32 scratch accumulator -----------
    B3, IN3, OUT3 = 64, 512, 256
    x3 = jax.random.normal(keys[6], (B3, IN3), dtype=jnp.bfloat16)
    bound3 = 1.0 / (IN3 ** 0.5)
    weight3 = jax.random.uniform(keys[7], (OUT3, IN3), jnp.float32, -bound3, bound3)
    bias3 = jax.random.uniform(keys[8], (OUT3,), jnp.float32, -bound3, bound3)

    wt3, b23 = prepare_fc_params(weight3, bias3)
    y3 = jax.block_until_ready(
        fc_forward(x3, wt3, b23, relu=True, block_k=128, allow_fast_path=False))
    y3_ref = _ref_fc(x3, weight3, bias3, relu=True,
                     compute_dtype=jnp.bfloat16).astype(jnp.bfloat16)
    assert y3.shape == (B3, OUT3)
    assert jnp.allclose(y3.astype(jnp.float32), y3_ref.astype(jnp.float32),
                        atol=2e-2, rtol=2e-2), "test3 mismatch"

    print("KERNEL_OK")
</pallas_src>

<mosaic_0001>
module attributes {stable_mosaic.version = 11 : i64} {
  func.func @_fc_kernel_nok(%arg0: i32, %arg1: i32, %arg2: memref<16x128xbf16, #tpu.memory_space<vmem>>, %arg3: memref<128x128xbf16, #tpu.memory_space<vmem>>, %arg4: memref<1x128xf32, #tpu.memory_space<vmem>>, %arg5: memref<16x128xf32, #tpu.memory_space<vmem>>) attributes {dimension_semantics = [#tpu.dimension_semantics<parallel>, #tpu.dimension_semantics<parallel>], iteration_bounds = array<i64: 1, 1>, scalar_prefetch = 0 : i64, scratch_operands = 0 : i64, tpu.core_type = #tpu.core_type<tc>, window_params = [{transform_indices = @transform_0, window_bounds = array<i64: 16, 128>}, {transform_indices = @transform_1, window_bounds = array<i64: 128, 128>}, {transform_indices = @transform_2, window_bounds = array<i64: 1, 128>}, {transform_indices = @transform_3, window_bounds = array<i64: 16, 128>}]} {
    %c0 = arith.constant 0 : index
    %c0_0 = arith.constant 0 : index
    %0 = vector.load %arg2[%c0, %c0_0] : memref<16x128xbf16, #tpu.memory_space<vmem>>, vector<16x128xbf16>
    %c0_1 = arith.constant 0 : index
    %c0_2 = arith.constant 0 : index
    %1 = vector.load %arg3[%c0_1, %c0_2] : memref<128x128xbf16, #tpu.memory_space<vmem>>, vector<128x128xbf16>
    %cst = arith.constant dense<0.000000e+00> : vector<16x128xf32>
    %2 = tpu.matmul %0, %1, %cst {dimension_numbers = #tpu.dot_dimension_numbers<[1], [0], [0], [1], [0, 0, 1, 1], [], []>} : vector<16x128xbf16>, vector<128x128xbf16>, vector<16x128xf32> -> vector<16x128xf32>
    %c0_3 = arith.constant 0 : index
    %c0_4 = arith.constant 0 : index
    %3 = vector.load %arg4[%c0_3, %c0_4] : memref<1x128xf32, #tpu.memory_space<vmem>>, vector<1x128xf32>
    %4 = vector.broadcast %3 : vector<1x128xf32> to vector<16x128xf32>
    %5 = arith.addf %2, %4 : vector<16x128xf32>
    %cst_5 = arith.constant 0.000000e+00 : f32
    %6 = vector.broadcast %cst_5 : f32 to vector<16x128xf32>
    %7 = arith.maximumf %5, %6 : vector<16x128xf32>
    %c0_6 = arith.constant 0 : index
    %c0_7 = arith.constant 0 : index
    %8 = vector.load %arg5[%c0_6, %c0_7] : memref<16x128xf32, #tpu.memory_space<vmem>>, vector<16x128xf32>
    tpu.vector_store %arg5[%c0_6, %c0_7], %7 {strides = array<i32>} : memref<16x128xf32, #tpu.memory_space<vmem>>, vector<16x128xf32>,
    return
  }
  func.func @transform_0(%arg0: i32, %arg1: i32) -> (i32, i32) {
    %c0_i32 = arith.constant 0 : i32
    %c0_i32_0 = arith.constant 0 : i32
    return %arg0, %c0_i32 : i32, i32
  }
  func.func @transform_1(%arg0: i32, %arg1: i32) -> (i32, i32) {
    %c0_i32 = arith.constant 0 : i32
    %c0_i32_0 = arith.constant 0 : i32
    return %c0_i32, %arg1 : i32, i32
  }
  func.func @transform_2(%arg0: i32, %arg1: i32) -> (i32, i32) {
    %c0_i32 = arith.constant 0 : i32
    %c0_i32_0 = arith.constant 0 : i32
    return %c0_i32, %arg1 : i32, i32
  }
  func.func @transform_3(%arg0: i32, %arg1: i32) -> (i32, i32) {
    %c0_i32 = arith.constant 0 : i32
    return %arg0, %arg1 : i32, i32
  }
}

</mosaic_0001>

<bundles_post_ra>
// kernel: tpu_custom_call.1
= control target key start
LH: loop header
LB: loop body
LE: loop exit
PB: predicated region body
PF: predicated region fallthrough
CT: control target
= control target key end

     0   :  { %8 = vsyncpa [#allocation3], 0  ;;  %s331_s0 = inlined_call_operand.hbm [shape: bf16[16,128], index: 0, kind: input, shape index: {}]   ;;  %s332_s1 = inlined_call_operand.hbm [shape: bf16[128,128], index: 1, kind: input, shape index: {}]   ;;  %s333_s2 = inlined_call_operand.vmem [shape: f32[1,128], index: 2, kind: input, shape index: {}]   ;;  %s334_s3 = inlined_call_operand.hbm [shape: f32[16,128], index: 3, kind: output, shape index: {}]  }
   0x1   :  { %9 = vsyncpa [#allocation6], 0 }
   0x2   :  { %10 = vsyncpa [#allocation4], 0  ;;  %s15_s14 = sshll.u32 %s331_s0, 4  ;;  %s292_s15 = smov [#allocation2]   ;;  %s16_s14 = int_to_ptr.hbm [resolvable:$true] %s15_s14 }
   0x3   :  { %s17_s16 = sshll.u32 %s292_s15, 4  ;;  %s28_s19 = sshll.u32 %s332_s1, 4  ;;  %s18_s16 = int_to_ptr.vmem [resolvable:$true] %s17_s16  ;;  %s29_s19 = int_to_ptr.hbm [resolvable:$true] %s28_s19 }
   0x4   :  { %s293_s20 = smov 64   ;;  %s294_s21 = smov 4  }
   0x5   :  { %23 = dma.hbm_to_vmem [thread:$0]  %s16_s14, 128, %s18_s16, [#allocation3], %s293_s20, %s293_s20, %s294_s21  }
   0x6   :  { %s295_s22 = smov [#allocation5]  }
   0x7   :  { %s30_s23 = sshll.u32 %s295_s22, 4  ;;  %s31_s23 = int_to_ptr.vmem [resolvable:$true] %s30_s23 }
   0x8   :  { %36 = dma.hbm_to_vmem [thread:$0]  %s29_s19, 1024, %s31_s23, [#allocation6], %s293_s20, %s293_s20, %s294_s21  }
   0x9   :  { %286 = dma.done.wait [#allocation3], 128  }
   0xa   :  { %287 = vsyncadd [#allocation3], 4294967168 }
   0xb   :  { %288 = dma.done.wait [#allocation6], 1024  }
   0xc   :  { %289 = vsyncadd [#allocation6], 4294966272  ;;  %v205_v0 = vld [vmem:[#allocation5 + $0x38] sm:$0xff]  ;;  %v204_v1 = vld [vmem:[#allocation5 + $0x30] sm:$0xff]  ;;  %s296_s24 = smov [#allocation7]   ;;  %s147_s28 = sshll.u32 %s334_s3, 4  ;;  %s148_s28 = int_to_ptr.hbm [resolvable:$true] %s147_s28 }
   0xd   :  { %123 = vmatpush.bf16.msra.mxu0 %v205_v0  ;;  %v203_v2 = vld [vmem:[#allocation5 + $0x28] sm:$0xff]  ;;  %v202_v3 = vld [vmem:[#allocation5 + $0x20] sm:$0xff]  ;;  %v201_v4 = vld [vmem:[#allocation5 + $0x18] sm:$0xff]  ;;  %s145_s25 = sshll.u32 %s296_s24, 4  ;;  %s297_s29 = smov 128   ;;  %s146_s25 = int_to_ptr.vmem [resolvable:$true] %s145_s25 }
   0xe   :  { %v200_v5 = vld [vmem:[#allocation5 + $0x10] sm:$0xff]  ;;  %v199_v6 = vld [vmem:[#allocation5 + $0x8] sm:$0xff]  ;;  %v198_v7 = vld [vmem:[#allocation5] sm:$0xff]  ;;  %s298_s30 = smov 8  }
   0xf   :  { %v197_v8 = vld [vmem:[#allocation2] sm:$0xff] }
  0x10   :  { %v213_v9 = vld [vmem:[%s333_s2] ss:$0 sm:$0xff] }
  0x11   :  { %124 = vmatpush.bf16.msra.mxu0 %v204_v1 }
  0x15   :  { %125 = vmatpush.bf16.msra.mxu0 %v203_v2 }
  0x19   :  { %126 = vmatpush.bf16.msra.mxu0 %v202_v3 }
  0x1d   :  { %127 = vmatpush.bf16.msra.mxu0 %v201_v4 }
  0x21   :  { %128 = vmatpush.bf16.msra.mxu0 %v200_v5 }
  0x25   :  { %129 = vmatpush.bf16.msra.mxu0 %v199_v6 }
  0x29   :  { %130 = vmatpush.bf16.msra.mxu0 %v198_v7 }
  0x2c   :  { %131 = vmatmul.bf16.vlgmr.msra.gmra.mxu0 %v197_v8 }
  0xa9   :  { %v132_v10 = vpop.f32.mrf.mxu0 }
  0xaa   :  { %v133_v11 = vadd.f32 %v213_v9, %v132_v10 }
  0xac   :  { %v137_v12 = vmax.f32 %v133_v11, 0.0 }
  0xae   :  { %139 = vst [vmem:[#allocation7] sm:$0xff] %v137_v12 }
  0xb1   :  { %v134_v13 = vpop.f32.mrf.mxu0 }
  0xb2   :  { %v135_v14 = vadd.f32 %v213_v9, %v134_v13 }
  0xb4   :  { %v138_v15 = vmax.f32 %v135_v14, 0.0 }
  0xb6   :  { %140 = vst [vmem:[#allocation7 + $0x8] sm:$0xff] %v138_v15 }
  0xb7   :  { %153 = dma.vmem_to_hbm [thread:$0]  %s146_s25, 256, %s148_s28, [#allocation4], %s297_s29, %s297_s29, %s298_s30  }
  0xb8   :  { %290 = dma.done.wait [#allocation4], 256  }
  0xb9   :  { %291 = vsyncadd [#allocation4], 4294967040 }
  0xba   :  { %158 = vsyncpa [#allocation3], 1 }
  0xbb   :  { %159 = vsyncpa [#allocation6], 1 }
  0xbc   :  { %160 = vsyncpa [#allocation4], 1 }

</bundles_post_ra>
